<compile_context>
chip_gen: v7x
topology: tpu7x:2x2x1
jax: 0.10.0
libtpu: 0.0.40
codegen_flags: <defaults>
</compile_context>

<pallas_src>
import functools

import jax
import jax.numpy as jnp
from jax.experimental import pallas as pl
from jax.experimental.pallas import tpu as pltpu


def _round_up(x, m):
    return (x + m - 1) // m * m


def _triplet_loss_kernel(anchor_ref, pos_ref, neg_ref, out_ref, *,
                         margin, n_neg, d, b_total, tb):
    """One B-tile: per-triplet losses reduced to a single partial sum.

    anchor_ref: (tb, d)        raw (un-normalized) anchors
    pos_ref:    (tb, d)        raw positives
    neg_ref:    (tb, n_neg*d)  raw negatives, flattened contiguously
    out_ref:    (1, 8, 128)    this tile's partial sum, broadcast across the
                               block (read element [i, 0, 0] outside)
    """
    # Clamp on the *squared* norm with eps^2; matches F.normalize(eps=1e-12)
    # for every vector with norm >= 1e-12.
    eps2 = 1e-24

    a = anchor_ref[...].astype(jnp.float32)      # (tb, d)
    p = pos_ref[...].astype(jnp.float32)         # (tb, d)

    # Normalization folded into per-row scales (rsqrt = single EUP op); no
    # normalized vectors are materialized.
    a_scale = jax.lax.rsqrt(jnp.maximum(jnp.sum(a * a, axis=-1, keepdims=True), eps2))
    p_scale = jax.lax.rsqrt(jnp.maximum(jnp.sum(p * p, axis=-1, keepdims=True), eps2))

    # anchor . positive (normalized): (tb, 1)
    ap = jnp.sum(a * p, axis=-1, keepdims=True) * (a_scale * p_scale)

    # Valid-row mask for the (possibly partial) edge tile: B is not padded,
    # the last block reads unspecified rows which are zeroed out here.
    row = pl.program_id(0) * tb + jax.lax.broadcasted_iota(
        jnp.int32, (a.shape[0], 1), 0)
    valid = row < b_total                                        # (tb, 1)

    # Unrolled VPU dot per negative. For unit vectors:
    #   ||a-p||^2 - ||a-n||^2 == 2*(a.n - a.p)
    acc = jnp.zeros_like(ap)                                     # (tb, 1)
    for k in range(n_neg):                                       # static unroll
        nk = neg_ref[:, k * d:(k + 1) * d].astype(jnp.float32)   # (tb, d)
        n_scale = jax.lax.rsqrt(
            jnp.maximum(jnp.sum(nk * nk, axis=-1, keepdims=True), eps2))
        an = jnp.sum(a * nk, axis=-1, keepdims=True) * (a_scale * n_scale)
        acc = acc + jnp.maximum(margin + 2.0 * (an - ap), 0.0)

    acc = jnp.where(valid, acc, 0.0)
    partial = jnp.sum(acc, axis=0, keepdims=True)                # (1, 1)
    out_ref[0] = jnp.broadcast_to(partial, out_ref.shape[1:])    # (8, 128)


def _vmem_limit_bytes():
    """Per-generation VMEM budget: ~5/8 of physical VMEM, capped.
    v5e/v6e have 128 MiB physical VMEM; v7x only 64 MiB per TensorCore."""
    default = 64 * 1024 * 1024
    try:
        cap = int(getattr(pltpu.get_tpu_info(), "vmem_capacity_bytes", default))
    except Exception:
        cap = default
    return int(min(cap * 5 // 8, 96 * 1024 * 1024))


def _choose_block_b(b, n_neg, d, itemsize, vmem_limit):
    """Pick a B-tile (multiple of 8) so the double-buffered
    anchor+positive+negatives blocks fit comfortably inside `vmem_limit`."""
    bytes_per_row = itemsize * d * (n_neg + 2)
    # One combined (anchor+pos+neg) block; x2 double-buffering must leave
    # headroom.  Cap at 24 MiB so the same budget also fits v7x (64 MiB VMEM).
    target_block_bytes = min(int(vmem_limit * 0.4), 24 * 1024 * 1024)
    tb = max(8, (target_block_bytes // max(bytes_per_row, 1)) // 8 * 8)
    tb = min(tb, _round_up(b, 8), 4096)
    # Megacore: keep >=2 grid steps when there is enough work so both v7x
    # TensorCores get a share of the "parallel" B axis.
    if b > 2 * 8 and pl.cdiv(b, tb) < 2:
        tb = max(8, _round_up(pl.cdiv(b, 2), 8))
    return int(tb)


def triplet_loss(anchor, positive, negatives, margin=1.0):
    """anchor: (B, D), positive: (B, D), negatives: (B, N, D) -> scalar loss.

    `negatives` corresponds to torch.stack(negative_embeds_list, dim=1).
    """
    b, d = anchor.shape
    n_neg = negatives.shape[1]

    # Contiguous, copy-free flatten: (B, N, D) -> (B, N*D).  No jnp.pad of B
    # or D anywhere (no extra HBM pass over the negatives array); the last
    # BlockSpec dims below use the full array extents.
    neg_flat = negatives.reshape(b, n_neg * d)

    vmem_limit = _vmem_limit_bytes()
    itemsize = jnp.dtype(anchor.dtype).itemsize
    tb = _choose_block_b(b, n_neg, d, itemsize, vmem_limit)
    grid = pl.cdiv(b, tb)

    kernel = functools.partial(
        _triplet_loss_kernel, margin=float(margin),
        n_neg=n_neg, d=d, b_total=b, tb=tb)

    partials = pl.pallas_call(
        kernel,
        out_shape=jax.ShapeDtypeStruct((grid, 8, 128), jnp.float32),
        grid_spec=pltpu.PrefetchScalarGridSpec(
            num_scalar_prefetch=0,
            grid=(grid,),
            in_specs=[
                pl.BlockSpec((tb, d), lambda i: (i, 0)),
                pl.BlockSpec((tb, d), lambda i: (i, 0)),
                pl.BlockSpec((tb, n_neg * d), lambda i: (i, 0)),
            ],
            out_specs=pl.BlockSpec((1, 8, 128), lambda i: (i, 0, 0)),
        ),
        compiler_params=pltpu.CompilerParams(
            dimension_semantics=("parallel",),   # B tiles independent -> both TCs on v7x
            vmem_limit_bytes=vmem_limit,
        ),
    )(anchor, positive, neg_flat)

    # Tiny final reduction (one float per grid step) in XLA.
    return jnp.sum(partials[:, 0, 0]) / (b * n_neg)


def triplet_loss_ref(anchor, positive, negatives, margin=1.0):
    """Pure-JAX reference mirroring the PyTorch module."""
    eps = 1e-12
    norm = lambda x: x / jnp.maximum(
        jnp.sqrt(jnp.sum(x * x, axis=-1, keepdims=True)), eps)
    a, p, n = norm(anchor), norm(positive), norm(negatives)
    pos_d = jnp.sum((a - p) ** 2, axis=-1)
    neg_d = jnp.sum((a[:, None, :] - n) ** 2, axis=-1)
    return jnp.mean(jnp.maximum(margin + pos_d[:, None] - neg_d, 0.0))


if __name__ == "__main__":
    B, D, N_NEG = 2, 32, 3  # batch, embedding dim, number of negatives
    key = jax.random.PRNGKey(0)
    k_a, k_p, k_n = jax.random.split(key, 3)

    anchor = jax.random.normal(k_a, (B, D), dtype=jnp.float32)
    positive = jax.random.normal(k_p, (B, D), dtype=jnp.float32)
    # negative_embeds_list (N_NEG tensors of shape (B, D)) stacked on dim=1.
    negatives = jax.random.normal(k_n, (B, N_NEG, D), dtype=jnp.float32)

    loss = jax.jit(triplet_loss)(anchor, positive, negatives)
    loss = jax.block_until_ready(loss)

    ref = triplet_loss_ref(anchor, positive, negatives, margin=1.0)
    # Pure f32 VPU math now (no MXU) -> tight tolerance.
    assert jnp.allclose(loss, ref, rtol=1e-4, atol=1e-5), (loss, ref)

    print("KERNEL_OK")
</pallas_src>

<mosaic_0001>
module attributes {stable_mosaic.version = 11 : i64} {
  func.func @_triplet_loss_kernel(%arg0: i32, %arg1: memref<8x32xf32, #tpu.memory_space<vmem>>, %arg2: memref<8x32xf32, #tpu.memory_space<vmem>>, %arg3: memref<8x96xf32, #tpu.memory_space<vmem>>, %arg4: memref<1x8x128xf32, #tpu.memory_space<vmem>>) attributes {dimension_semantics = [#tpu.dimension_semantics<parallel>], iteration_bounds = array<i64: 1>, scalar_prefetch = 0 : i64, scratch_operands = 0 : i64, tpu.core_type = #tpu.core_type<tc>, window_params = [{transform_indices = @transform_0, window_bounds = array<i64: 8, 32>}, {transform_indices = @transform_1, window_bounds = array<i64: 8, 32>}, {transform_indices = @transform_2, window_bounds = array<i64: 8, 96>}, {transform_indices = @transform_3, window_bounds = array<i64: 1, 8, 128>}]} {
    %c0 = arith.constant 0 : index
    %c0_0 = arith.constant 0 : index
    %0 = vector.load %arg1[%c0, %c0_0] : memref<8x32xf32, #tpu.memory_space<vmem>>, vector<8x32xf32>
    %c0_1 = arith.constant 0 : index
    %c0_2 = arith.constant 0 : index
    %1 = vector.load %arg2[%c0_1, %c0_2] : memref<8x32xf32, #tpu.memory_space<vmem>>, vector<8x32xf32>
    %2 = arith.mulf %0, %0 : vector<8x32xf32>
    %cst = arith.constant dense<0.000000e+00> : vector<8xf32>
    %3 = vector.multi_reduction <add>, %2, %cst [1] : vector<8x32xf32> to vector<8xf32>
    %4 = vector.shape_cast %3 : vector<8xf32> to vector<8x1xf32>
    %cst_3 = arith.constant 1.000000e-24 : f32
    %5 = vector.broadcast %cst_3 : f32 to vector<8x1xf32>
    %6 = arith.maximumf %4, %5 : vector<8x1xf32>
    %7 = math.rsqrt %6 : vector<8x1xf32>
    %8 = arith.mulf %1, %1 : vector<8x32xf32>
    %cst_4 = arith.constant dense<0.000000e+00> : vector<8xf32>
    %9 = vector.multi_reduction <add>, %8, %cst_4 [1] : vector<8x32xf32> to vector<8xf32>
    %10 = vector.shape_cast %9 : vector<8xf32> to vector<8x1xf32>
    %cst_5 = arith.constant 1.000000e-24 : f32
    %11 = vector.broadcast %cst_5 : f32 to vector<8x1xf32>
    %12 = arith.maximumf %10, %11 : vector<8x1xf32>
    %13 = math.rsqrt %12 : vector<8x1xf32>
    %14 = arith.mulf %0, %1 : vector<8x32xf32>
    %cst_6 = arith.constant dense<0.000000e+00> : vector<8xf32>
    %15 = vector.multi_reduction <add>, %14, %cst_6 [1] : vector<8x32xf32> to vector<8xf32>
    %16 = vector.shape_cast %15 : vector<8xf32> to vector<8x1xf32>
    %17 = arith.mulf %7, %13 : vector<8x1xf32>
    %18 = arith.mulf %16, %17 : vector<8x1xf32>
    %c8_i32 = arith.constant 8 : i32
    %19 = arith.muli %arg0, %c8_i32 : i32
    %20 = tpu.iota {dimensions = array<i32: 0>} : vector<8x1xi32>
    %21 = vector.broadcast %19 : i32 to vector<8x1xi32>
    %22 = arith.addi %21, %20 : vector<8x1xi32>
    %c2_i32 = arith.constant 2 : i32
    %23 = vector.broadcast %c2_i32 : i32 to vector<8x1xi32>
    %24 = arith.cmpi slt, %22, %23 : vector<8x1xi32>
    %cst_7 = arith.constant 0.000000e+00 : f32
    %25 = vector.broadcast %cst_7 : f32 to vector<8x1xf32>
    %c0_8 = arith.constant 0 : index
    %c0_9 = arith.constant 0 : index
    %26 = vector.load %arg3[%c0_8, %c0_9] : memref<8x96xf32, #tpu.memory_space<vmem>>, vector<8x32xf32>
    %27 = arith.mulf %26, %26 : vector<8x32xf32>
    %cst_10 = arith.constant dense<0.000000e+00> : vector<8xf32>
    %28 = vector.multi_reduction <add>, %27, %cst_10 [1] : vector<8x32xf32> to vector<8xf32>
    %29 = vector.shape_cast %28 : vector<8xf32> to vector<8x1xf32>
    %cst_11 = arith.constant 1.000000e-24 : f32
    %30 = vector.broadcast %cst_11 : f32 to vector<8x1xf32>
    %31 = arith.maximumf %29, %30 : vector<8x1xf32>
    %32 = math.rsqrt %31 : vector<8x1xf32>
    %33 = arith.mulf %0, %26 : vector<8x32xf32>
    %cst_12 = arith.constant dense<0.000000e+00> : vector<8xf32>
    %34 = vector.multi_reduction <add>, %33, %cst_12 [1] : vector<8x32xf32> to vector<8xf32>
    %35 = vector.shape_cast %34 : vector<8xf32> to vector<8x1xf32>
    %36 = arith.mulf %7, %32 : vector<8x1xf32>
    %37 = arith.mulf %35, %36 : vector<8x1xf32>
    %38 = arith.subf %37, %18 : vector<8x1xf32>
    %cst_13 = arith.constant 2.000000e+00 : f32
    %39 = vector.broadcast %cst_13 : f32 to vector<8x1xf32>
    %40 = arith.mulf %39, %38 : vector<8x1xf32>
    %cst_14 = arith.constant 1.000000e+00 : f32
    %41 = vector.broadcast %cst_14 : f32 to vector<8x1xf32>
    %42 = arith.addf %41, %40 : vector<8x1xf32>
    %cst_15 = arith.constant 0.000000e+00 : f32
    %43 = vector.broadcast %cst_15 : f32 to vector<8x1xf32>
    %44 = arith.maximumf %42, %43 : vector<8x1xf32>
    %45 = arith.addf %25, %44 : vector<8x1xf32>
    %c0_16 = arith.constant 0 : index
    %c32 = arith.constant 32 : index
    %46 = vector.load %arg3[%c0_16, %c32] : memref<8x96xf32, #tpu.memory_space<vmem>>, vector<8x32xf32>
    %47 = arith.mulf %46, %46 : vector<8x32xf32>
    %cst_17 = arith.constant dense<0.000000e+00> : vector<8xf32>
    %48 = vector.multi_reduction <add>, %47, %cst_17 [1] : vector<8x32xf32> to vector<8xf32>
    %49 = vector.shape_cast %48 : vector<8xf32> to vector<8x1xf32>
    %cst_18 = arith.constant 1.000000e-24 : f32
    %50 = vector.broadcast %cst_18 : f32 to vector<8x1xf32>
    %51 = arith.maximumf %49, %50 : vector<8x1xf32>
    %52 = math.rsqrt %51 : vector<8x1xf32>
    %53 = arith.mulf %0, %46 : vector<8x32xf32>
    %cst_19 = arith.constant dense<0.000000e+00> : vector<8xf32>
    %54 = vector.multi_reduction <add>, %53, %cst_19 [1] : vector<8x32xf32> to vector<8xf32>
    %55 = vector.shape_cast %54 : vector<8xf32> to vector<8x1xf32>
    %56 = arith.mulf %7, %52 : vector<8x1xf32>
    %57 = arith.mulf %55, %56 : vector<8x1xf32>
    %58 = arith.subf %57, %18 : vector<8x1xf32>
    %cst_20 = arith.constant 2.000000e+00 : f32
    %59 = vector.broadcast %cst_20 : f32 to vector<8x1xf32>
    %60 = arith.mulf %59, %58 : vector<8x1xf32>
    %cst_21 = arith.constant 1.000000e+00 : f32
    %61 = vector.broadcast %cst_21 : f32 to vector<8x1xf32>
    %62 = arith.addf %61, %60 : vector<8x1xf32>
    %cst_22 = arith.constant 0.000000e+00 : f32
    %63 = vector.broadcast %cst_22 : f32 to vector<8x1xf32>
    %64 = arith.maximumf %62, %63 : vector<8x1xf32>
    %65 = arith.addf %45, %64 : vector<8x1xf32>
    %c0_23 = arith.constant 0 : index
    %c64 = arith.constant 64 : index
    %66 = vector.load %arg3[%c0_23, %c64] : memref<8x96xf32, #tpu.memory_space<vmem>>, vector<8x32xf32>
    %67 = arith.mulf %66, %66 : vector<8x32xf32>
    %cst_24 = arith.constant dense<0.000000e+00> : vector<8xf32>
    %68 = vector.multi_reduction <add>, %67, %cst_24 [1] : vector<8x32xf32> to vector<8xf32>
    %69 = vector.shape_cast %68 : vector<8xf32> to vector<8x1xf32>
    %cst_25 = arith.constant 1.000000e-24 : f32
    %70 = vector.broadcast %cst_25 : f32 to vector<8x1xf32>
    %71 = arith.maximumf %69, %70 : vector<8x1xf32>
    %72 = math.rsqrt %71 : vector<8x1xf32>
    %73 = arith.mulf %0, %66 : vector<8x32xf32>
    %cst_26 = arith.constant dense<0.000000e+00> : vector<8xf32>
    %74 = vector.multi_reduction <add>, %73, %cst_26 [1] : vector<8x32xf32> to vector<8xf32>
    %75 = vector.shape_cast %74 : vector<8xf32> to vector<8x1xf32>
    %76 = arith.mulf %7, %72 : vector<8x1xf32>
    %77 = arith.mulf %75, %76 : vector<8x1xf32>
    %78 = arith.subf %77, %18 : vector<8x1xf32>
    %cst_27 = arith.constant 2.000000e+00 : f32
    %79 = vector.broadcast %cst_27 : f32 to vector<8x1xf32>
    %80 = arith.mulf %79, %78 : vector<8x1xf32>
    %cst_28 = arith.constant 1.000000e+00 : f32
    %81 = vector.broadcast %cst_28 : f32 to vector<8x1xf32>
    %82 = arith.addf %81, %80 : vector<8x1xf32>
    %cst_29 = arith.constant 0.000000e+00 : f32
    %83 = vector.broadcast %cst_29 : f32 to vector<8x1xf32>
    %84 = arith.maximumf %82, %83 : vector<8x1xf32>
    %85 = arith.addf %65, %84 : vector<8x1xf32>
    %cst_30 = arith.constant 0.000000e+00 : f32
    %86 = vector.broadcast %cst_30 : f32 to vector<8x1xf32>
    %87 = arith.select %24, %85, %86 : vector<8x1xi1>, vector<8x1xf32>
    %cst_31 = arith.constant dense<0.000000e+00> : vector<1xf32>
    %88 = vector.multi_reduction <add>, %87, %cst_31 [0] : vector<8x1xf32> to vector<1xf32>
    %89 = vector.shape_cast %88 : vector<1xf32> to vector<1x1xf32>
    %90 = vector.shape_cast %89 : vector<1x1xf32> to vector<1x1xf32>
    %91 = vector.broadcast %90 : vector<1x1xf32> to vector<8x128xf32>
    %c0_32 = arith.constant 0 : index
    %c0_33 = arith.constant 0 : index
    %c0_34 = arith.constant 0 : index
    %92 = vector.load %arg4[%c0_32, %c0_33, %c0_34] : memref<1x8x128xf32, #tpu.memory_space<vmem>>, vector<1x8x128xf32>
    %93 = vector.shape_cast %92 : vector<1x8x128xf32> to vector<8x128xf32>
    %94 = vector.shape_cast %91 : vector<8x128xf32> to vector<1x8x128xf32>
    tpu.vector_store %arg4[%c0_32, %c0_33, %c0_34], %94 {strides = array<i32>} : memref<1x8x128xf32, #tpu.memory_space<vmem>>, vector<1x8x128xf32>,
    return
  }
  func.func @transform_0(%arg0: i32) -> (i32, i32) {
    %c0_i32 = arith.constant 0 : i32
    %c0_i32_0 = arith.constant 0 : i32
    return %arg0, %c0_i32 : i32, i32
  }
  func.func @transform_1(%arg0: i32) -> (i32, i32) {
    %c0_i32 = arith.constant 0 : i32
    %c0_i32_0 = arith.constant 0 : i32
    return %arg0, %c0_i32 : i32, i32
  }
  func.func @transform_2(%arg0: i32) -> (i32, i32) {
    %c0_i32 = arith.constant 0 : i32
    %c0_i32_0 = arith.constant 0 : i32
    return %arg0, %c0_i32 : i32, i32
  }
  func.func @transform_3(%arg0: i32) -> (i32, i32, i32) {
    %c0_i32 = arith.constant 0 : i32
    %c0_i32_0 = arith.constant 0 : i32
    %c0_i32_1 = arith.constant 0 : i32
    return %arg0, %c0_i32, %c0_i32_0 : i32, i32, i32
  }
}

</mosaic_0001>

<bundles_post_ra>
// kernel: triplet_loss.1
= control target key start
LH: loop header
LB: loop body
LE: loop exit
PB: predicated region body
PF: predicated region fallthrough
CT: control target
= control target key end

     0   :  { %s129_s14 = smov 96   ;;  %s130_s15 = smov 64   ;;  %vm17_vm0 = vcmask 261120   ;;  %v36_v54 = vlaneseq  ;;  %s172_s2 = inlined_call_operand.vmem [shape: f32[2,96], index: 2, kind: input, shape index: {}]   ;;  %s173_s0 = inlined_call_operand.vmem [shape: f32[2,32], index: 0, kind: input, shape index: {}]   ;;  %s174_s1 = inlined_call_operand.vmem [shape: f32[2,32], index: 1, kind: input, shape index: {}]   ;;  %s175_s3 = inlined_call_operand.vmem [shape: f32[1,8,128], index: 3, kind: output, shape index: {}]  }
   0x1   :  { %v41_v0 = vld [vmem:[%s172_s2] sm:$0xff] }
   0x2   :  { %v42_v1 = vmul.f32 %v41_v0, %v41_v0  ;;  %69 = vrot.lane.b32.xlu1 %v41_v0, %s129_s14  ;;  %v14_v2 = vld [vmem:[%s173_s0] sm:$0xff]  ;;  %v37_v60 = vshrl.u32 %v36_v54, 7 }
   0x3   :  { %v16_v3 = vmul.f32 %v14_v2, %v14_v2  ;;  %v15_v4 = vld [vmem:[%s174_s1] sm:$0xff]  ;;  %v48_v13 = vmul.f32 %v41_v0, %v14_v2 }
   0x4   :  { %60 = vrot.lane.b32.xlu0 %v42_v1, %s129_s14  ;;  %v23_v5 = vmul.f32 %v15_v4, %v15_v4  ;;  %v43_v8 = vsel %vm17_vm0, %v42_v1, 0.0  ;;  %v29_v10 = vmul.f32 %v15_v4, %v14_v2  ;;  %vm40_vm1 = vcmp.lt.s32.totalorder %v37_v60, 2 }
   0x5   :  { %v18_v6 = vsel %vm17_vm0, %v16_v3, 0.0  ;;  %v49_v19 = vsel %vm17_vm0, %v48_v13, 0.0 }
   0x6   :  { %91 = vrot.lane.b32.xlu1 %v41_v0, %s130_s15  ;;  %v24_v7 = vsel %vm17_vm0, %v23_v5, 0.0  ;;  %v30_v14 = vsel %vm17_vm0, %v29_v10, 0.0 }
   0x8   :  { %83 = vrot.lane.b32.xlu0 %v42_v1, %s130_s15 }
  0x27   :  { %19 = vadd.xlane.f32.xlu0 %v18_v6 }
  0x2a   :  { %25 = vadd.xlane.f32.xlu1 %v24_v7 }
  0x2b   :  { %44 = vadd.xlane.f32.xlu0 %v43_v8 }
  0x74   :  { %v70_v9 = vpop.permute.xlu1 %69 }
  0x75   :  { %v72_v15 = vmul.f32 %v70_v9, %v14_v2 }
  0x76   :  { %v61_v11 = vpop.permute.xlu0 %60 }
  0x77   :  { %v63_v12 = vsel %vm17_vm0, %v61_v11, 0.0  ;;  %v73_v21 = vsel %vm17_vm0, %v72_v15, 0.0 }
  0x78   :  { %64 = vadd.xlane.f32.xlu0 %v63_v12  ;;  %v92_v17 = vpop.permute.xlu1 %91 }
  0x79   :  { %v94_v20 = vmul.f32 %v92_v17, %v14_v2 }
  0x7a   :  { %v84_v16 = vpop.permute.xlu0 %83 }
  0x7b   :  { %v86_v18 = vsel %vm17_vm0, %v84_v16, 0.0  ;;  %v95_v22 = vsel %vm17_vm0, %v94_v20, 0.0 }
  0x7c   :  { %87 = vadd.xlane.f32.xlu1 %v86_v18  ;;  %31 = vadd.xlane.f32.xlu0 %v30_v14 }
  0x80   :  { %50 = vadd.xlane.f32.xlu1 %v49_v19  ;;  %74 = vadd.xlane.f32.xlu0 %v73_v21 }
  0x84   :  { %96 = vadd.xlane.f32.xlu1 %v95_v22 }
  0xb4   :  { %v20_v23 = vpop.xlane.xlu0 %19 }
  0xb5   :  { %v21_v26 = vmax.f32 %v20_v23, 1e-24 }
  0xb7   :  { %v26_v24 = vpop.xlane.xlu1 %25  ;;  %119 = vrsqrt.f32 %v21_v26 }
  0xb8   :  { %v45_v25 = vpop.xlane.xlu0 %44  ;;  %v27_v27 = vmax.f32 %v26_v24, 1e-24 }
  0xb9   :  { %v46_v28 = vmax.f32 %v45_v25, 1e-24 }
  0xba   :  { %121 = vrsqrt.f32 %v27_v27 }
  0xbb   :  { %123 = vrsqrt.f32 %v46_v28 }
  0xc1   :  { %v120_v30 = vpop.eup %119 }
  0xc4   :  { %v122_v32 = vpop.eup %121 }
  0xc5   :  { %v124_v33 = vpop.eup %123  ;;  %v33_v37 = vmul.f32 %v122_v32, %v120_v30 }
  0xc6   :  { %v52_v36 = vmul.f32 %v124_v33, %v120_v30 }
 0x105   :  { %v65_v29 = vpop.xlane.xlu0 %64 }
 0x106   :  { %v66_v31 = vmax.f32 %v65_v29, 1e-24 }
 0x108   :  { %125 = vrsqrt.f32 %v66_v31 }
 0x109   :  { %v88_v34 = vpop.xlane.xlu1 %87  ;;  %v32_v38 = vpop.xlane.xlu0 %31 }
 0x10a   :  { %v89_v35 = vmax.f32 %v88_v34, 1e-24  ;;  %v34_v41 = vmul.f32 %v33_v37, %v32_v38 }
 0x10c   :  { %127 = vrsqrt.f32 %v89_v35 }
 0x10d   :  { %v51_v39 = vpop.xlane.xlu1 %50  ;;  %v75_v43 = vpop.xlane.xlu0 %74 }
 0x10e   :  { %v53_v40 = vmul.f32 %v52_v36, %v51_v39 }
 0x110   :  { %v54_v44 = vsub.f32 %v53_v40, %v34_v41 }
 0x111   :  { %v97_v48 = vpop.xlane.xlu1 %96 }
 0x112   :  { %v126_v42 = vpop.eup %125  ;;  %v55_v49 = vmul.f32 2.0, %v54_v44 }
 0x113   :  { %v76_v45 = vmul.f32 %v126_v42, %v120_v30 }
 0x114   :  { %v56_v55 = vadd.f32 1.0, %v55_v49 }
 0x115   :  { %v77_v46 = vmul.f32 %v76_v45, %v75_v43 }
 0x116   :  { %v128_v47 = vpop.eup %127  ;;  %v57_v61 = vmax.f32 %v56_v55, 0.0 }
 0x117   :  { %v78_v50 = vsub.f32 %v77_v46, %v34_v41  ;;  %v98_v51 = vmul.f32 %v128_v47, %v120_v30 }
 0x119   :  { %v79_v52 = vmul.f32 2.0, %v78_v50  ;;  %v99_v53 = vmul.f32 %v98_v51, %v97_v48 }
 0x11b   :  { %v80_v56 = vadd.f32 1.0, %v79_v52  ;;  %v100_v57 = vsub.f32 %v99_v53, %v34_v41 }
 0x11d   :  { %v81_v58 = vmax.f32 %v80_v56, 0.0  ;;  %v101_v59 = vmul.f32 2.0, %v100_v57 }
 0x11f   :  { %v102_v62 = vadd.f32 1.0, %v101_v59  ;;  %v82_v63 = vadd.f32 %v81_v58, %v57_v61 }
 0x121   :  { %v103_v0 = vmax.f32 %v102_v62, 0.0 }
 0x123   :  { %v104_v1 = vadd.f32 %v103_v0, %v82_v63 }
 0x125   :  { %v105_v2 = vsel %vm40_vm1, %v104_v1, 0.0 }
 0x126   :  { %v106_v3 = vrot.slane %v105_v2, 4 }
 0x128   :  { %v107_v4 = vadd.f32 %v106_v3, %v105_v2 }
 0x12a   :  { %v108_v5 = vrot.slane %v107_v4, 2 }
 0x12c   :  { %v109_v6 = vadd.f32 %v108_v5, %v107_v4 }
 0x12e   :  { %v110_v7 = vrot.slane %v109_v6, 1 }
 0x130   :  { %v111_v8 = vadd.f32 %v110_v7, %v109_v6 }
 0x132   :  { %112 = vst [vmem:[%s175_s3] sm:$0xff] %v111_v8 }

</bundles_post_ra>
